<compile_context>
chip_gen: v7x
topology: tpu7x:2x2x1
jax: 0.10.0
libtpu: 0.0.40
codegen_flags: <defaults>
</compile_context>

<pallas_src>
import jax
import jax.numpy as jnp
from jax.experimental import pallas as pl
from jax.experimental.pallas import tpu as pltpu

K_IN = 784       # 28*28 input features (no K padding)
H = 128          # hidden width
N_OUT = 10       # real number of classes
N_PAD = 128      # lane-dense padded output width
NEG_INF = -1e30  # padded-logit bias so exp(pad - max) == 0 exactly


def mlp_kernel(x_ref, w1_ref, b1_ref, w2_ref, b2_ref, o_ref):
    # ---- fc1 + ReLU : in-kernel bf16 cast, MXU matmul, f32 accumulate ----
    x = x_ref[...].astype(jnp.bfloat16)                          # (TB, 784)
    h = jnp.dot(x, w1_ref[...], preferred_element_type=jnp.float32)
    h = jnp.maximum(h + b1_ref[...], 0.0)                        # (TB, 128)

    # ---- dropout(p=0.2): identity in eval mode ----
    # TODO(synk): training-mode stochastic dropout not implemented
    # (would use pltpu.prng_seed + pltpu.prng_random_bits in-kernel).

    # ---- fc2 (lane-dense, zero-padded weight cols, -1e30 padded bias) ----
    logits = jnp.dot(h.astype(jnp.bfloat16), w2_ref[...],
                     preferred_element_type=jnp.float32)
    logits = logits + b2_ref[...]                                # (TB, 128)

    # ---- numerically-stable softmax over all 128 lanes ----
    m = jnp.max(logits, axis=-1, keepdims=True)
    e = jnp.exp(logits - m)                                      # pad lanes -> 0
    denom = jnp.sum(e, axis=-1, keepdims=True)
    o_ref[...] = e * pl.reciprocal(denom, approx=True)


def _round_up(n, m):
    return ((n + m - 1) // m) * m


def _choose_tb(bp):
    """Batch tile: >=2 grid steps when possible (v7x dual-TC), tile <= 1024
    rows so double-buffered f32 x tiles + outputs + resident weights stay
    well under v5e's 16 MiB scoped-VMEM default (~9 MiB at TB=1024)."""
    half = _round_up(pl.cdiv(bp, 2), 8)
    return max(8, min(1024, half))


def prepare_params(w1, b1, w2, b2):
    """One-time weight/bias layout prep (hoisted out of the per-call path).

    w1 (784,128), b1 (1,128), w2 (128,10), b2 (1,10) in pre-transposed
    nn.Linear layout.  fc2 is padded to 128 lanes: zero weight columns and
    -1e30 bias columns so the padded logits vanish under softmax."""
    w1_p = w1.astype(jnp.bfloat16)                               # (784, 128)
    b1_p = b1.astype(jnp.float32).reshape(1, H)                  # (1, 128)
    w2_p = jnp.pad(w2.astype(jnp.bfloat16),
                   ((0, 0), (0, N_PAD - N_OUT)))                 # (128, 128)
    b2_p = jnp.pad(b2.astype(jnp.float32).reshape(1, N_OUT),
                   ((0, 0), (0, N_PAD - N_OUT)),
                   constant_values=NEG_INF)                      # (1, 128)
    return w1_p, b1_p, w2_p, b2_p


def mlp_forward(x, w1_p, b1_p, w2_p, b2_p):
    """x: (B, 1, 28, 28) or (B, 784) float32; params from prepare_params().
    Returns (B, 10) softmax probabilities."""
    x2d = x.reshape(-1, K_IN)
    B = x2d.shape[0]

    # Tiny row pad only if B is not a multiple of 8 (sublane constraint).
    Bp = _round_up(B, 8)
    if Bp != B:
        x2d = jnp.pad(x2d, ((0, Bp - B), (0, 0)))

    TB = _choose_tb(Bp)
    grid = (pl.cdiv(Bp, TB),)   # ragged last tile allowed; OOB rows discarded

    flops = 2 * Bp * (K_IN * H + H * N_PAD)
    bytes_accessed = (x2d.size * 4 + w1_p.size * 2 + w2_p.size * 2
                      + b1_p.size * 4 + b2_p.size * 4 + Bp * N_PAD * 4)

    out = pl.pallas_call(
        mlp_kernel,
        out_shape=jax.ShapeDtypeStruct((Bp, N_PAD), jnp.float32),
        grid=grid,
        in_specs=[
            pl.BlockSpec((TB, K_IN), lambda i: (i, 0)),   # x: batch-tiled f32
            pl.BlockSpec((K_IN, H),  lambda i: (0, 0)),   # w1: resident
            pl.BlockSpec((1, H),     lambda i: (0, 0)),   # b1: resident
            pl.BlockSpec((H, N_PAD), lambda i: (0, 0)),   # w2: resident
            pl.BlockSpec((1, N_PAD), lambda i: (0, 0)),   # b2: resident
        ],
        out_specs=pl.BlockSpec((TB, N_PAD), lambda i: (i, 0)),
        compiler_params=pltpu.CompilerParams(
            dimension_semantics=("parallel",)),
        cost_estimate=pl.CostEstimate(
            flops=flops,
            transcendentals=Bp * N_PAD,
            bytes_accessed=bytes_accessed),
    )(x2d, w1_p, b1_p, w2_p, b2_p)

    return out[:B, :N_OUT]


def init_params(key):
    """Deterministic init matching the PyTorch Linear layer shapes.

    fc1: Linear(784, 128) -> W1 (784, 128) pre-transposed, b1 (1, 128)
    fc2: Linear(128, 10)  -> W2 (128, 10)  pre-transposed, b2 (1, 10)
    """
    k1, k2, k3, k4 = jax.random.split(key, 4)
    lim1 = 1.0 / jnp.sqrt(784.0)
    lim2 = 1.0 / jnp.sqrt(128.0)
    w1 = jax.random.uniform(k1, (784, 128), jnp.float32, -lim1, lim1)
    b1 = jax.random.uniform(k2, (1, 128), jnp.float32, -lim1, lim1)
    w2 = jax.random.uniform(k3, (128, 10), jnp.float32, -lim2, lim2)
    b2 = jax.random.uniform(k4, (1, 10), jnp.float32, -lim2, lim2)
    return w1, b1, w2, b2


if __name__ == "__main__":
    key = jax.random.PRNGKey(0)
    k_x, k_p = jax.random.split(key)

    # Small MNIST-like batch: (batch=8, channels=1, 28, 28).
    x = jax.random.normal(k_x, (8, 1, 28, 28), jnp.float32)
    w1, b1, w2, b2 = init_params(k_p)

    # One-time weight layout prep, outside the jitted per-call path.
    params = prepare_params(w1, b1, w2, b2)

    fwd = jax.jit(mlp_forward)
    out = jax.block_until_ready(fwd(x, *params))

    # Reference follows the same bf16-input / f32-accumulate MXU path.
    xb = x.reshape(-1, 784).astype(jnp.bfloat16)
    ref_h = jnp.maximum(
        jnp.dot(xb, w1.astype(jnp.bfloat16),
                preferred_element_type=jnp.float32) + b1, 0.0)
    ref_logits = jnp.dot(ref_h.astype(jnp.bfloat16), w2.astype(jnp.bfloat16),
                         preferred_element_type=jnp.float32) + b2
    ref = jax.nn.softmax(ref_logits, axis=-1)

    assert out.shape == (8, 10)
    assert jnp.allclose(out, ref, atol=5e-3), float(jnp.max(jnp.abs(out - ref)))
    assert jnp.allclose(jnp.sum(out, axis=-1), 1.0, atol=5e-3)

    print("KERNEL_OK")
</pallas_src>

<mosaic_0001>
module attributes {stable_mosaic.version = 11 : i64} {
  func.func @mlp_kernel(%arg0: i32, %arg1: memref<8x784xf32, #tpu.memory_space<vmem>>, %arg2: memref<784x128xbf16, #tpu.memory_space<vmem>>, %arg3: memref<1x128xf32, #tpu.memory_space<vmem>>, %arg4: memref<128x128xbf16, #tpu.memory_space<vmem>>, %arg5: memref<1x128xf32, #tpu.memory_space<vmem>>, %arg6: memref<8x128xf32, #tpu.memory_space<vmem>>) attributes {dimension_semantics = [#tpu.dimension_semantics<parallel>], iteration_bounds = array<i64: 1>, scalar_prefetch = 0 : i64, scratch_operands = 0 : i64, tpu.core_type = #tpu.core_type<tc>, window_params = [{transform_indices = @transform_0, window_bounds = array<i64: 8, 784>}, {pipeline_mode = #tpu.pipeline_mode<synchronous>, transform_indices = @transform_1, window_bounds = array<i64: 784, 128>}, {pipeline_mode = #tpu.pipeline_mode<synchronous>, transform_indices = @transform_2, window_bounds = array<i64: 1, 128>}, {pipeline_mode = #tpu.pipeline_mode<synchronous>, transform_indices = @transform_3, window_bounds = array<i64: 128, 128>}, {pipeline_mode = #tpu.pipeline_mode<synchronous>, transform_indices = @transform_4, window_bounds = array<i64: 1, 128>}, {transform_indices = @transform_5, window_bounds = array<i64: 8, 128>}]} {
    %c0 = arith.constant 0 : index
    %c0_0 = arith.constant 0 : index
    %0 = vector.load %arg1[%c0, %c0_0] : memref<8x784xf32, #tpu.memory_space<vmem>>, vector<8x784xf32>
    %1 = arith.truncf %0 : vector<8x784xf32> to vector<8x784xbf16>
    %c0_1 = arith.constant 0 : index
    %c0_2 = arith.constant 0 : index
    %2 = vector.load %arg2[%c0_1, %c0_2] : memref<784x128xbf16, #tpu.memory_space<vmem>>, vector<784x128xbf16>
    %cst = arith.constant dense<0.000000e+00> : vector<8x128xf32>
    %3 = tpu.matmul %1, %2, %cst {dimension_numbers = #tpu.dot_dimension_numbers<[1], [0], [0], [1], [0, 0, 1, 1], [], []>} : vector<8x784xbf16>, vector<784x128xbf16>, vector<8x128xf32> -> vector<8x128xf32>
    %c0_3 = arith.constant 0 : index
    %c0_4 = arith.constant 0 : index
    %4 = vector.load %arg3[%c0_3, %c0_4] : memref<1x128xf32, #tpu.memory_space<vmem>>, vector<1x128xf32>
    %5 = vector.broadcast %4 : vector<1x128xf32> to vector<8x128xf32>
    %6 = arith.addf %3, %5 : vector<8x128xf32>
    %cst_5 = arith.constant 0.000000e+00 : f32
    %7 = vector.broadcast %cst_5 : f32 to vector<8x128xf32>
    %8 = arith.maximumf %6, %7 : vector<8x128xf32>
    %9 = arith.truncf %8 : vector<8x128xf32> to vector<8x128xbf16>
    %c0_6 = arith.constant 0 : index
    %c0_7 = arith.constant 0 : index
    %10 = vector.load %arg4[%c0_6, %c0_7] : memref<128x128xbf16, #tpu.memory_space<vmem>>, vector<128x128xbf16>
    %cst_8 = arith.constant dense<0.000000e+00> : vector<8x128xf32>
    %11 = tpu.matmul %9, %10, %cst_8 {dimension_numbers = #tpu.dot_dimension_numbers<[1], [0], [0], [1], [0, 0, 1, 1], [], []>} : vector<8x128xbf16>, vector<128x128xbf16>, vector<8x128xf32> -> vector<8x128xf32>
    %c0_9 = arith.constant 0 : index
    %c0_10 = arith.constant 0 : index
    %12 = vector.load %arg5[%c0_9, %c0_10] : memref<1x128xf32, #tpu.memory_space<vmem>>, vector<1x128xf32>
    %13 = vector.broadcast %12 : vector<1x128xf32> to vector<8x128xf32>
    %14 = arith.addf %11, %13 : vector<8x128xf32>
    %cst_11 = arith.constant dense<0xFF800000> : vector<8xf32>
    %15 = vector.multi_reduction <maximumf>, %14, %cst_11 [1] : vector<8x128xf32> to vector<8xf32>
    %16 = vector.shape_cast %15 : vector<8xf32> to vector<8x1xf32>
    %17 = vector.broadcast %16 : vector<8x1xf32> to vector<8x128xf32>
    %18 = arith.subf %14, %17 : vector<8x128xf32>
    %19 = math.exp %18 : vector<8x128xf32>
    %cst_12 = arith.constant dense<0.000000e+00> : vector<8xf32>
    %20 = vector.multi_reduction <add>, %19, %cst_12 [1] : vector<8x128xf32> to vector<8xf32>
    %21 = vector.shape_cast %20 : vector<8xf32> to vector<8x1xf32>
    %22 = tpu.reciprocal %21 {approx = true} : vector<8x1xf32> -> vector<8x1xf32>
    %23 = vector.broadcast %22 : vector<8x1xf32> to vector<8x128xf32>
    %24 = arith.mulf %19, %23 : vector<8x128xf32>
    %c0_13 = arith.constant 0 : index
    %c0_14 = arith.constant 0 : index
    %25 = vector.load %arg6[%c0_13, %c0_14] : memref<8x128xf32, #tpu.memory_space<vmem>>, vector<8x128xf32>
    tpu.vector_store %arg6[%c0_13, %c0_14], %24 {strides = array<i32>} : memref<8x128xf32, #tpu.memory_space<vmem>>, vector<8x128xf32>,
    return
  }
  func.func @transform_0(%arg0: i32) -> (i32, i32) {
    %c0_i32 = arith.constant 0 : i32
    %c0_i32_0 = arith.constant 0 : i32
    return %arg0, %c0_i32 : i32, i32
  }
  func.func @transform_1(%arg0: i32) -> (i32, i32) {
    %c0_i32 = arith.constant 0 : i32
    %c0_i32_0 = arith.constant 0 : i32
    %c0_i32_1 = arith.constant 0 : i32
    return %c0_i32, %c0_i32_0 : i32, i32
  }
  func.func @transform_2(%arg0: i32) -> (i32, i32) {
    %c0_i32 = arith.constant 0 : i32
    %c0_i32_0 = arith.constant 0 : i32
    %c0_i32_1 = arith.constant 0 : i32
    return %c0_i32, %c0_i32_0 : i32, i32
  }
  func.func @transform_3(%arg0: i32) -> (i32, i32) {
    %c0_i32 = arith.constant 0 : i32
    %c0_i32_0 = arith.constant 0 : i32
    %c0_i32_1 = arith.constant 0 : i32
    return %c0_i32, %c0_i32_0 : i32, i32
  }
  func.func @transform_4(%arg0: i32) -> (i32, i32) {
    %c0_i32 = arith.constant 0 : i32
    %c0_i32_0 = arith.constant 0 : i32
    %c0_i32_1 = arith.constant 0 : i32
    return %c0_i32, %c0_i32_0 : i32, i32
  }
  func.func @transform_5(%arg0: i32) -> (i32, i32) {
    %c0_i32 = arith.constant 0 : i32
    %c0_i32_0 = arith.constant 0 : i32
    return %arg0, %c0_i32 : i32, i32
  }
}

</mosaic_0001>

<bundles_post_ra>
// kernel: mlp_forward.1
= control target key start
LH: loop header
LB: loop body
LE: loop exit
PB: predicated region body
PF: predicated region fallthrough
CT: control target
= control target key end

     0   :  { %v987_v44 = vmov 0.0   ;;  %vm988_vm0 = vmmov 0   ;;  %vm435_vm1 = vcmask 130048   ;;  %s1243_s0 = inlined_call_operand.vmem [shape: f32[8,784], index: 0, kind: input, shape index: {}]   ;;  %s1244_s1 = inlined_call_operand.vmem [shape: bf16[784,128], index: 1, kind: input, shape index: {}]   ;;  %s1245_s2 = inlined_call_operand.vmem [shape: f32[1,128], index: 2, kind: input, shape index: {}]   ;;  %s1246_s3 = inlined_call_operand.vmem [shape: bf16[128,128], index: 3, kind: input, shape index: {}]   ;;  %s1247_s4 = inlined_call_operand.vmem [shape: f32[1,128], index: 4, kind: input, shape index: {}]   ;;  %s1248_s5 = inlined_call_operand.hbm [shape: f32[8,128], index: 5, kind: output, shape index: {}]  }
   0x1   :  { %v902_v0 = vld [vmem:[%s1244_s1 + $0x40] sm:$0xff]   ;;  %v906_v4 = vld [vmem:[%s1244_s1 + $0x48] sm:$0xff]   ;;  %v910_v8 = vld [vmem:[%s1244_s1 + $0x50] sm:$0xff]  }
   0x2   :  { %v903_v1 = vld [vmem:[%s1244_s1] sm:$0xff]   ;;  %796 = vmatprep.subr.bf16.mxu0 %v902_v0  ;;  %v907_v5 = vld [vmem:[%s1244_s1 + $0x8] sm:$0xff]   ;;  %v911_v9 = vld [vmem:[%s1244_s1 + $0x10] sm:$0xff]  }
   0x3   :  { %v904_v2 = vld [vmem:[%s1244_s1 + $0xc0] sm:$0xff]   ;;  %797 = vmatpush3.bf16.msra.mxu0 %v903_v1  ;;  %v908_v6 = vld [vmem:[%s1244_s1 + $0xc8] sm:$0xff]   ;;  %v912_v10 = vld [vmem:[%s1244_s1 + $0xd0] sm:$0xff]  }
   0x4   :  { %v905_v3 = vld [vmem:[%s1244_s1 + $0x80] sm:$0xff]   ;;  %818 = vmatprep.subr.bf16.mxu1 %v904_v2  ;;  %798 = vmatprep.subr.bf16.mxu0 %v906_v4  ;;  %v909_v7 = vld [vmem:[%s1244_s1 + $0x88] sm:$0xff]   ;;  %v913_v11 = vld [vmem:[%s1244_s1 + $0x90] sm:$0xff]  }
   0x5   :  { %819 = vmatpush3.bf16.msra.mxu1 %v905_v3  ;;  %v914_v12 = vld [vmem:[%s1244_s1 + $0x58] sm:$0xff]   ;;  %v918_v16 = vld [vmem:[%s1244_s1 + $0x60] sm:$0xff]   ;;  %v922_v20 = vld [vmem:[%s1244_s1 + $0x68] sm:$0xff]  }
   0x6   :  { %820 = vmatprep.subr.bf16.mxu1 %v908_v6  ;;  %v915_v13 = vld [vmem:[%s1244_s1 + $0x18] sm:$0xff]   ;;  %v919_v17 = vld [vmem:[%s1244_s1 + $0x20] sm:$0xff]   ;;  %v923_v21 = vld [vmem:[%s1244_s1 + $0x28] sm:$0xff]  }
   0x7   :  { %799 = vmatpush3.bf16.msra.mxu0 %v907_v5  ;;  %v916_v14 = vld [vmem:[%s1244_s1 + $0xd8] sm:$0xff]   ;;  %v920_v18 = vld [vmem:[%s1244_s1 + $0xe0] sm:$0xff]   ;;  %v924_v22 = vld [vmem:[%s1244_s1 + $0xe8] sm:$0xff]  }
   0x8   :  { %800 = vmatprep.subr.bf16.mxu0 %v910_v8  ;;  %v917_v15 = vld [vmem:[%s1244_s1 + $0x98] sm:$0xff]   ;;  %v921_v19 = vld [vmem:[%s1244_s1 + $0xa0] sm:$0xff]   ;;  %v925_v23 = vld [vmem:[%s1244_s1 + $0xa8] sm:$0xff]  }
   0x9   :  { %821 = vmatpush3.bf16.msra.mxu1 %v909_v7  ;;  %v926_v24 = vld [vmem:[%s1244_s1 + $0x70] sm:$0xff]   ;;  %v930_v28 = vld [vmem:[%s1244_s1 + $0x78] sm:$0xff]   ;;  %v23_v31 = vld [vmem:[%s1243_s0 + $0x8] sm:$0xff] }
   0xa   :  { %822 = vmatprep.subr.bf16.mxu1 %v912_v10  ;;  %v927_v25 = vld [vmem:[%s1244_s1 + $0x30] sm:$0xff]   ;;  %v931_v29 = vld [vmem:[%s1244_s1 + $0x38] sm:$0xff]   ;;  %v30_v32 = vpack.c.bf16 %v23_v31, %v23_v31  ;;  %v22_v34 = vld [vmem:[%s1243_s0] sm:$0xff] }
   0xb   :  { %801 = vmatpush3.bf16.msra.mxu0 %v911_v9  ;;  %v928_v26 = vld [vmem:[%s1244_s1 + $0xf0] sm:$0xff]   ;;  %v932_v30 = vld [vmem:[%s1244_s1 + $0xf8] sm:$0xff]   ;;  %v29_v35 = vpack.c.bf16 %v22_v34, %v22_v34  ;;  %v934_v36 = vld [vmem:[%s1244_s1 + $0x140] sm:$0xff]  }
   0xc   :  { %802 = vmatprep.subr.bf16.mxu0 %v914_v12  ;;  %v929_v27 = vld [vmem:[%s1244_s1 + $0xb0] sm:$0xff]   ;;  %v933_v33 = vld [vmem:[%s1244_s1 + $0xb8] sm:$0xff]   ;;  %471 = vmatprep.mubr.bf16.mxu0 %v30_v32  ;;  %v935_v39 = vld [vmem:[%s1244_s1 + $0x100] sm:$0xff]  }
   0xd   :  { %823 = vmatpush3.bf16.msra.mxu1 %v913_v11  ;;  %v25_v37 = vld [vmem:[%s1243_s0 + $0x18] sm:$0xff]  ;;  %v24_v40 = vld [vmem:[%s1243_s0 + $0x10] sm:$0xff]  ;;  %v936_v42 = vld [vmem:[%s1244_s1 + $0x148] sm:$0xff]  }
   0xe   :  { %824 = vmatprep.subr.bf16.mxu1 %v916_v14  ;;  %v32_v38 = vpack.c.bf16 %v25_v37, %v25_v37  ;;  %v31_v41 = vpack.c.bf16 %v24_v40, %v24_v40  ;;  %v937_v43 = vld [vmem:[%s1244_s1 + $0x108] sm:$0xff]   ;;  %v938_v45 = vld [vmem:[%s1244_s1 + $0x150] sm:$0xff]   ;;  %v940_v47 = vld [vmem:[%s1244_s1 + $0x158] sm:$0xff]  }
   0xf   :  { %803 = vmatpush3.bf16.msra.mxu0 %v915_v13  ;;  %v939_v46 = vld [vmem:[%s1244_s1 + $0x110] sm:$0xff]   ;;  %v941_v48 = vld [vmem:[%s1244_s1 + $0x118] sm:$0xff]   ;;  %v942_v49 = vld [vmem:[%s1244_s1 + $0x160] sm:$0xff]  }
  0x10   :  { %804 = vmatprep.subr.bf16.mxu0 %v918_v16  ;;  %511 = vmatprep.mubr.bf16.mxu1 %v32_v38  ;;  %v943_v50 = vld [vmem:[%s1244_s1 + $0x120] sm:$0xff]   ;;  %v944_v51 = vld [vmem:[%s1244_s1 + $0x168] sm:$0xff]   ;;  %v946_v55 = vld [vmem:[%s1244_s1 + $0x170] sm:$0xff]  }
  0x11   :  { %825 = vmatpush3.bf16.msra.mxu1 %v917_v15  ;;  %v945_v52 = vld [vmem:[%s1244_s1 + $0x128] sm:$0xff]   ;;  %v950_v53 = vld [vmem:[%s1244_s1 + $0x180] sm:$0xff]   ;;  %v28_v57 = vld [vmem:[%s1243_s0 + $0x30] sm:$0xff] }
  0x12   :  { %826 = vmatprep.subr.bf16.mxu1 %v920_v18  ;;  %v27_v54 = vld [vmem:[%s1243_s0 + $0x28] sm:$0xff]  ;;  %v35_v58 = vpack.c.bf16 %v28_v57, %v28_v57  ;;  %v947_v59 = vld [vmem:[%s1244_s1 + $0x130] sm:$0xff]  }
  0x13   :  { %805 = vmatpush3.bf16.msra.mxu0 %v919_v17  ;;  %v34_v56 = vpack.c.bf16 %v27_v54, %v27_v54 }
  0x14   :  { %806 = vmatprep.subr.bf16.mxu0 %v922_v20 }
  0x15   :  { %827 = vmatpush3.bf16.msra.mxu1 %v921_v19 }
  0x16   :  { %828 = vmatprep.subr.bf16.mxu1 %v924_v22 }
  0x17   :  { %807 = vmatpush3.bf16.msra.mxu0 %v923_v21 }
  0x18   :  { %808 = vmatprep.subr.bf16.mxu0 %v926_v24 }
  0x19   :  { %829 = vmatpush3.bf16.msra.mxu1 %v925_v23 }
  0x1a   :  { %830 = vmatprep.subr.bf16.mxu1 %v928_v26 }
  0x1b   :  { %809 = vmatpush3.bf16.msra.mxu0 %v927_v25 }
  0x1c   :  { %810 = vmatprep.subr.bf16.mxu0 %v930_v28 }
  0x1d   :  { %831 = vmatpush3.bf16.msra.mxu1 %v929_v27 }
  0x1e   :  { %832 = vmatprep.subr.bf16.mxu1 %v932_v30 }
  0x1f   :  { %811 = vmatpush3.bf16.msra.mxu0 %v931_v29 }
  0x20   :  { %840 = vmatprep.subr.bf16.mxu0 %v934_v36 }
  0x21   :  { %833 = vmatpush3.bf16.msra.mxu1 %v933_v33 }
  0x22   :  { %472 = vmatmul.mubr.bf16.vlgmr.msra.gmra.mrb[0].mxu0 %v29_v35  ;;  %873 = vmatprep.subr.bf16.mxu1 %v987_v44 }
  0x23   :  { %841 = vmatpush3.bf16.msra.mxu0 %v935_v39  ;;  %551 = vmatprep.mubr.bf16.mxu0 %v34_v56 }
  0x24   :  { %512 = vmatmul.mubr.bf16.vlgmr.msra.gmra.mrb[0].mxu1 %v31_v41  ;;  %842 = vmatprep.subr.bf16.mxu0 %v936_v42 }
  0x25   :  { %875 = vmatprep.mubr.msk.bf16.mxu1 %vm988_vm0, %v987_v44  ;;  %874 = vmatpush3.bf16.msra.mxu1 %v950_v53 }
  0x26   :  { %879 = vmatprep.subr.bf16.mxu1 %v987_v44 }
  0x27   :  { %843 = vmatpush3.bf16.msra.mxu0 %v937_v43 }
  0x28   :  { %844 = vmatprep.subr.bf16.mxu0 %v938_v45 }
  0x2b   :  { %845 = vmatpush3.bf16.msra.mxu0 %v939_v46 }
  0x2c   :  { %846 = vmatprep.subr.bf16.mxu0 %v940_v47  ;;  %876 = vmatmul.mubr.msk.bf16.vlgmr.msra.gmra.mrb[4].mxu1 %vm435_vm1, %v35_v58 }
  0x2d   :  { %895 = vmatprep.mubr.msk.bf16.mxu1 %vm988_vm0, %v987_v44 }
  0x2f   :  { %847 = vmatpush3.bf16.msra.mxu0 %v941_v48 }
  0x30   :  { %848 = vmatprep.subr.bf16.mxu0 %v942_v49 }
  0x33   :  { %849 = vmatpush3.bf16.msra.mxu0 %v943_v50 }
  0x34   :  { %850 = vmatprep.subr.bf16.mxu0 %v944_v51 }
  0x37   :  { %851 = vmatpush3.bf16.msra.mxu0 %v945_v52 }
  0x38   :  { %10 = vsyncpa [#allocation3], 0  ;;  %852 = vmatprep.subr.bf16.mxu0 %v946_v55  ;;  %v948_v60 = vld [vmem:[%s1244_s1 + $0x178] sm:$0xff]   ;;  %v26_v62 = vld [vmem:[%s1243_s0 + $0x20] sm:$0xff]  ;;  %s989_s21 = smov [#allocation2]  }
  0x39   :  { %v949_v61 = vld [vmem:[%s1244_s1 + $0x138] sm:$0xff]   ;;  %v33_v63 = vpack.c.bf16 %v26_v62, %v26_v62  ;;  %v951_v0 = vld [vmem:[%s1246_s3] sm:$0xff]   ;;  %v952_v1 = vld [vmem:[%s1246_s3 + $0x8] sm:$0xff]   ;;  %s728_s22 = sshll.u32 %s989_s21, 4  ;;  %s729_s22 = int_to_ptr.vmem [resolvable:$true] %s728_s22 }
  0x3a   :  { %880 = vmatpush3.bf16.msra.mxu1 %v951_v0  ;;  %v953_v2 = vld [vmem:[%s1246_s3 + $0x10] sm:$0xff]   ;;  %v954_v3 = vld [vmem:[%s1246_s3 + $0x18] sm:$0xff]   ;;  %v955_v4 = vld [vmem:[%s1246_s3 + $0x20] sm:$0xff]   ;;  %p968_p1 = scmp.lt.s32.totalorder %s729_s22, %s729_s22 }
  0x3b   :  { %853 = vmatpush3.bf16.msra.mxu0 %v947_v59  ;;  %881 = vmatprep.subr.bf16.mxu1 %v987_v44  ;;  %v956_v5 = vld [vmem:[%s1246_s3 + $0x28] sm:$0xff]   ;;  %v957_v6 = vld [vmem:[%s1246_s3 + $0x30] sm:$0xff]   ;;  %v958_v7 = vld [vmem:[%s1246_s3 + $0x38] sm:$0xff]  }
  0x3c   :  { %854 = vmatprep.subr.bf16.mxu0 %v948_v60  ;;  %v736_v9 = vld [vmem:[%s1245_s2] ss:$0 sm:$0xff] }
  0x3d   :  { %v787_v34 = vld [vmem:[%s1247_s4] ss:$0 sm:$0xff]  ;;  %s963_s4 = scalar_lea.vmem %s729_s22, 128 }
  0x3e   :  { %882 = vmatpush3.bf16.msra.mxu1 %v952_v1  ;;  %p964_p0 = scmp.ne.s32.totalorder %s729_s22, %s963_s4  ;;  %p969_p2 = scmp.lt.s32.totalorder %s963_s4, %s963_s4 }
  0x3f   :  { %855 = vmatpush3.bf16.msra.mxu0 %v949_v61  ;;  %883 = vmatprep.subr.bf16.mxu1 %v987_v44 }
  0x40   :  { %p970_p3 = por %p969_p2, %p968_p1 }
  0x42   :  { %552 = vmatmul.mubr.bf16.vlgmr.msra.gmra.mrb[4].mxu0 %v33_v63  ;;  %884 = vmatpush3.bf16.msra.mxu1 %v953_v2  ;;  %p971_p4 = pnand %p970_p3, %p964_p0 }
  0x43   :  { %885 = vmatprep.subr.bf16.mxu1 %v987_v44 }
  0x46   :  { %886 = vmatpush3.bf16.msra.mxu1 %v954_v3 }
  0x47   :  { %887 = vmatprep.subr.bf16.mxu1 %v987_v44 }
  0x4a   :  { %888 = vmatpush3.bf16.msra.mxu1 %v955_v4 }
  0x4b   :  { %889 = vmatprep.subr.bf16.mxu1 %v987_v44 }
  0x4e   :  { %890 = vmatpush3.bf16.msra.mxu1 %v956_v5 }
  0x4f   :  { %891 = vmatprep.subr.bf16.mxu1 %v987_v44 }
  0x52   :  { %892 = vmatpush3.bf16.msra.mxu1 %v957_v6 }
  0x53   :  { %893 = vmatprep.subr.bf16.mxu1 %v987_v44 }
  0x56   :  { %894 = vmatpush3.bf16.msra.mxu1 %v958_v7 }
  0xf5   :  { %v812_v8 = vpop.f32.mrb[0].mxu0 }
  0xf6   :  { %v813_v10 = vpop.f32.mrb[1].mxu0 }
  0xf7   :  { %v814_v11 = vadd.f32 %v813_v10, %v812_v8  ;;  %v815_v12 = vpop.f32.mrb[2].mxu0  ;;  %v834_v13 = vpop.f32.mrb[0].mxu1 }
  0xf8   :  { %v816_v14 = vpop.f32.mrb[3].mxu0  ;;  %v835_v16 = vpop.f32.mrb[1].mxu1 }
  0xf9   :  { %v474_v15 = vadd.f32 %v814_v11, %v736_v9  ;;  %v836_v17 = vadd.f32 %v835_v16, %v834_v13  ;;  %v837_v18 = vpop.f32.mrb[2].mxu1 }
  0xfa   :  { %v838_v19 = vpop.f32.mrb[3].mxu1 }
  0xfb   :  { %v514_v20 = vadd.f32 %v836_v17, %v474_v15 }
  0xff   :  { %v593_v21 = vpop.f32.mrb[4].mxu1 }
 0x100   :  { %v877_v22 = vpop.f32.mrb[5].mxu1 }
 0x101   :  { %v596_v23 = vpop.f32.mrb[6].mxu1 }
 0x102   :  { %v878_v24 = vpop.f32.mrb[7].mxu1 }
 0x115   :  { %v856_v25 = vpop.f32.mrb[4].mxu0 }
 0x116   :  { %v857_v26 = vpop.f32.mrb[5].mxu0 }
 0x117   :  { %v858_v27 = vadd.f32 %v857_v26, %v856_v25  ;;  %v859_v28 = vpop.f32.mrb[6].mxu0 }
 0x118   :  { %v860_v29 = vpop.f32.mrb[7].mxu0 }
 0x119   :  { %v554_v30 = vadd.f32 %v858_v27, %v514_v20 }
 0x11b   :  { %v594_v31 = vadd.f32 %v593_v21, %v554_v30 }
 0x11d   :  { %v599_v32 = vmax.f32 %v594_v31, 0.0 }
 0x11f   :  { %v600_v33 = vpack.c.bf16 %v599_v32, %v599_v32 }
 0x121   :  { %896 = vmatmul.mubr.bf16.vlgmr.msra.gmra.mrb[8].mxu1 %v600_v33 }
 0x1f4   :  { %v706_v35 = vpop.f32.mrb[8].mxu1 }
 0x1f5   :  { %v707_v36 = vadd.f32 %v787_v34, %v706_v35  ;;  %v897_v37 = vpop.f32.mrb[9].mxu1 }
 0x1f6   :  { %v709_v38 = vpop.f32.mrb[10].mxu1 }
 0x1f7   :  { %712 = vmax.xlane.f32.xlu0 %v707_v36  ;;  %v898_v39 = vpop.f32.mrb[11].mxu1 }
 0x284   :  { %v713_v40 = vpop.xlane.xlu0 %712 }
 0x285   :  { %v714_v41 = vsub.f32 %v707_v36, %v713_v40 }
 0x287   :  { %v715_v42 = vmul.f32 1.442695, %v714_v41 }
 0x289   :  { %959 = vpow2.f32 %v715_v42 }
 0x293   :  { %v960_v43 = vpop.eup %959 }
 0x294   :  { %717 = vadd.xlane.f32.xlu0 %v960_v43 }
 0x321   :  { %v718_v44 = vpop.xlane.xlu0 %717 }
 0x322   :  { %961 = vrcp.f32 %v718_v44 }
 0x32c   :  { %v962_v45 = vpop.eup %961 }
 0x32d   :  { %v720_v46 = vmul.f32 %v962_v45, %v960_v43 }
 0x32f   :  { %721 = vst [vmem:[#allocation2] sm:$0xff] %v720_v46 }
 0x330   :  { %974 = shalt.err (!%p971_p4)
}
 0x331   :  { %s975_s25 = scalar_lea.hbm %s1248_s5, 128 }
 0x332   :  { %p976_p5 = scmp.ne.s32.totalorder %s1248_s5, %s975_s25  ;;  %p979_p6 = scmp.lt.u32.totalorder %s975_s25, %s1248_s5 }
 0x334   :  { %p981_p7 = pnand %p979_p6, %p976_p5 }
 0x336   :  { %984 = shalt.err (!%p981_p7)
}
 0x337   :  { %731 = dma.vmem_to_hbm [thread:$0]  %s729_s22, 128, %s1248_s5, [#allocation3]  }
 0x338   :  { %985 = dma.done.wait [#allocation3], 128  }
 0x339   :  { %986 = vsyncadd [#allocation3], 4294967168 }
 0x33a   :  { %735 = vsyncpa [#allocation3], 1 }

</bundles_post_ra>
